<compile_context>
chip_gen: v6e
topology: v6e:2x2x1
jax: 0.10.0
libtpu: 0.0.40
codegen_flags: <defaults>
</compile_context>

<pallas_src>
import functools

import jax
import jax.numpy as jnp
from jax import lax
from jax.experimental import pallas as pl
from jax.experimental.pallas import tpu as pltpu

LANE = 128
SUBLANE = 8
MAX_BLOCK_ROWS = 2048   # 2048*128*4B = 1 MiB per f32 input tile


# ---------------- kernels ----------------

def _make_reduce_kernel(num_rows, block_rows, need_mask, has_weight):
    """Per-block partial sums: num = sum(|x-t|*w) [, den = sum(w)] as (8,128) slabs."""
    groups = block_rows // SUBLANE

    def kernel(*refs):
        if has_weight:
            x_ref, t_ref, w_ref, num_ref, den_ref = refs
        else:
            x_ref, t_ref, num_ref = refs

        x = x_ref[...].astype(jnp.float32)
        t = t_ref[...].astype(jnp.float32)
        if has_weight:
            w = w_ref[...].astype(jnp.float32)
            d = jnp.abs(x - t) * w
        else:
            d = jnp.abs(x - t)

        if need_mask:
            # Last grid block may read past the real rows (unspecified values);
            # zero them so they contribute nothing to either sum.
            row = (lax.broadcasted_iota(jnp.int32, (block_rows, LANE), 0)
                   + pl.program_id(0) * block_rows)
            in_bounds = row < num_rows
            d = jnp.where(in_bounds, d, 0.0)
            if has_weight:
                w = jnp.where(in_bounds, w, 0.0)

        # (block_rows,128) -> (8,128): pure VPU adds (co-issue with the loads).
        # The cross-lane/sublane reduction happens once, outside the kernel.
        num_ref[...] = jnp.sum(d.reshape(groups, SUBLANE, LANE), axis=0)
        if has_weight:
            den_ref[...] = jnp.sum(w.reshape(groups, SUBLANE, LANE), axis=0)

    return kernel


def _none_weighted_kernel(x_ref, t_ref, w_ref, o_ref):
    o_ref[...] = (jnp.abs(x_ref[...] - t_ref[...]) * w_ref[...]).astype(o_ref.dtype)


def _none_unweighted_kernel(x_ref, t_ref, o_ref):
    o_ref[...] = jnp.abs(x_ref[...] - t_ref[...]).astype(o_ref.dtype)


# ---------------- wrapper ----------------

def _to_slab(a, rows):
    """Flatten to a lane-dense [rows, 128] slab (zero pad only if numel % 1024 != 0)."""
    flat = a.reshape(-1)
    pad = rows * LANE - flat.shape[0]
    if pad:
        flat = jnp.pad(flat, (0, pad))
    return flat.reshape(rows, LANE)


@functools.partial(jax.jit, static_argnames=("reduction",))
def weighted_l1_loss(x, target, weight=None, reduction='mean'):
    if reduction not in ('mean', 'sum', 'none'):
        raise ValueError(f"unsupported reduction: {reduction}")
    # TODO(synk): the PyTorch module emits warnings.warn on size mismatch; that is a
    # host-side check with no kernel equivalent (shapes here are assumed to match).

    orig_shape = x.shape
    orig_dtype = x.dtype
    n = x.size
    itemsize = jnp.dtype(orig_dtype).itemsize
    has_w = weight is not None

    chunk = SUBLANE * LANE
    R = pl.cdiv(n, chunk) * SUBLANE              # rows, always a multiple of 8
    block_rows = R if R <= MAX_BLOCK_ROWS else MAX_BLOCK_ROWS
    grid_n = pl.cdiv(R, block_rows)
    need_mask = (R % block_rows) != 0            # only possible when grid_n > 1

    ops = [_to_slab(x, R), _to_slab(target, R)]
    if has_w:
        ops.append(_to_slab(weight, R))

    in_tile = pl.BlockSpec((block_rows, LANE), lambda i: (i, 0))
    in_specs = [in_tile] * len(ops)

    if reduction == 'none':
        kernel = _none_weighted_kernel if has_w else _none_unweighted_kernel
        ce = pl.CostEstimate(flops=(3 if has_w else 2) * n,
                             transcendentals=0,
                             bytes_accessed=(len(ops) + 1) * n * itemsize)
        out = pl.pallas_call(
            kernel,
            out_shape=jax.ShapeDtypeStruct((R, LANE), orig_dtype),
            grid_spec=pltpu.PrefetchScalarGridSpec(
                num_scalar_prefetch=0,
                grid=(grid_n,),
                in_specs=in_specs,
                out_specs=in_tile),
            compiler_params=pltpu.CompilerParams(
                dimension_semantics=("parallel",)),
            cost_estimate=ce,
        )(*ops)
        return out.reshape(-1)[:n].reshape(orig_shape)

    # 'mean' / 'sum': per-block lane-dense partial sums; tiny final reduce in JAX.
    kernel = _make_reduce_kernel(R, block_rows, need_mask, has_w)
    n_out = 2 if has_w else 1
    part_shape = jax.ShapeDtypeStruct((grid_n * SUBLANE, LANE), jnp.float32)
    part_spec = pl.BlockSpec((SUBLANE, LANE), lambda i: (i, 0))
    ce = pl.CostEstimate(
        flops=(5 if has_w else 3) * n,
        transcendentals=0,
        bytes_accessed=len(ops) * n * itemsize + n_out * grid_n * SUBLANE * LANE * 4)

    result = pl.pallas_call(
        kernel,
        out_shape=tuple([part_shape] * n_out),
        grid_spec=pltpu.PrefetchScalarGridSpec(
            num_scalar_prefetch=0,
            grid=(grid_n,),
            in_specs=in_specs,
            out_specs=[part_spec] * n_out),
        compiler_params=pltpu.CompilerParams(
            dimension_semantics=("parallel",)),
        cost_estimate=ce,
    )(*ops)

    num = jnp.sum(result[0])                     # fp32 accumulation
    if reduction == 'sum':
        return num.astype(orig_dtype)
    den = jnp.sum(result[1]) if has_w else jnp.asarray(n, dtype=jnp.float32)
    return (num / den).astype(orig_dtype)


# ---------------- demo ----------------

if __name__ == "__main__":
    key = jax.random.PRNGKey(0)
    k1, k2, k3 = jax.random.split(key, 3)

    # NCHW-style small shapes consistent with a typical use of this loss.
    shape = (2, 4, 16, 16)
    x = jax.random.normal(k1, shape, dtype=jnp.float32)
    t = jax.random.normal(k2, shape, dtype=jnp.float32)
    w = jax.random.uniform(k3, shape, dtype=jnp.float32)

    # weighted mean reduction (the default)
    out_mean = weighted_l1_loss(x, t, w, reduction='mean')
    # weighted sum reduction
    out_sum = weighted_l1_loss(x, t, w, reduction='sum')
    # no reduction (elementwise)
    out_none = weighted_l1_loss(x, t, w, reduction='none')
    # weight=None path (plain L1 loss, mean)
    out_l1 = weighted_l1_loss(x, t, None, reduction='mean')

    jax.block_until_ready((out_mean, out_sum, out_none, out_l1))

    # quick sanity check against pure-JAX reference
    ref_mean = jnp.sum(jnp.abs(x - t) * w) / jnp.sum(w)
    ref_sum = jnp.sum(jnp.abs(x - t) * w)
    ref_none = jnp.abs(x - t) * w
    ref_l1 = jnp.mean(jnp.abs(x - t))
    assert jnp.allclose(out_mean, ref_mean, rtol=1e-5, atol=1e-5)
    assert jnp.allclose(out_sum, ref_sum, rtol=1e-5, atol=1e-4)
    assert jnp.allclose(out_none, ref_none, rtol=1e-5, atol=1e-5)
    assert jnp.allclose(out_l1, ref_l1, rtol=1e-5, atol=1e-5)

    print("KERNEL_OK")
</pallas_src>

<mosaic_0001>
module attributes {stable_mosaic.version = 11 : i64} {
  func.func @kernel(%arg0: i32, %arg1: memref<16x128xf32, #tpu.memory_space<vmem>>, %arg2: memref<16x128xf32, #tpu.memory_space<vmem>>, %arg3: memref<16x128xf32, #tpu.memory_space<vmem>>, %arg4: memref<8x128xf32, #tpu.memory_space<vmem>>, %arg5: memref<8x128xf32, #tpu.memory_space<vmem>>) attributes {dimension_semantics = [#tpu.dimension_semantics<parallel>], iteration_bounds = array<i64: 1>, scalar_prefetch = 0 : i64, scratch_operands = 0 : i64, tpu.core_type = #tpu.core_type<tc>, window_params = [{transform_indices = @transform_0, window_bounds = array<i64: 16, 128>}, {transform_indices = @transform_1, window_bounds = array<i64: 16, 128>}, {transform_indices = @transform_2, window_bounds = array<i64: 16, 128>}, {transform_indices = @transform_3, window_bounds = array<i64: 8, 128>}, {transform_indices = @transform_4, window_bounds = array<i64: 8, 128>}]} {
    %c0 = arith.constant 0 : index
    %c0_0 = arith.constant 0 : index
    %0 = vector.load %arg1[%c0, %c0_0] : memref<16x128xf32, #tpu.memory_space<vmem>>, vector<16x128xf32>
    %c0_1 = arith.constant 0 : index
    %c0_2 = arith.constant 0 : index
    %1 = vector.load %arg2[%c0_1, %c0_2] : memref<16x128xf32, #tpu.memory_space<vmem>>, vector<16x128xf32>
    %c0_3 = arith.constant 0 : index
    %c0_4 = arith.constant 0 : index
    %2 = vector.load %arg3[%c0_3, %c0_4] : memref<16x128xf32, #tpu.memory_space<vmem>>, vector<16x128xf32>
    %3 = arith.subf %0, %1 : vector<16x128xf32>
    %4 = math.absf %3 : vector<16x128xf32>
    %5 = arith.mulf %4, %2 : vector<16x128xf32>
    %6 = vector.shape_cast %5 : vector<16x128xf32> to vector<2x8x128xf32>
    %cst = arith.constant dense<0.000000e+00> : vector<8x128xf32>
    %7 = vector.multi_reduction <add>, %6, %cst [0] : vector<2x8x128xf32> to vector<8x128xf32>
    %c0_5 = arith.constant 0 : index
    %c0_6 = arith.constant 0 : index
    %8 = vector.load %arg4[%c0_5, %c0_6] : memref<8x128xf32, #tpu.memory_space<vmem>>, vector<8x128xf32>
    tpu.vector_store %arg4[%c0_5, %c0_6], %7 {strides = array<i32>} : memref<8x128xf32, #tpu.memory_space<vmem>>, vector<8x128xf32>,
    %9 = vector.shape_cast %2 : vector<16x128xf32> to vector<2x8x128xf32>
    %cst_7 = arith.constant dense<0.000000e+00> : vector<8x128xf32>
    %10 = vector.multi_reduction <add>, %9, %cst_7 [0] : vector<2x8x128xf32> to vector<8x128xf32>
    %c0_8 = arith.constant 0 : index
    %c0_9 = arith.constant 0 : index
    %11 = vector.load %arg5[%c0_8, %c0_9] : memref<8x128xf32, #tpu.memory_space<vmem>>, vector<8x128xf32>
    tpu.vector_store %arg5[%c0_8, %c0_9], %10 {strides = array<i32>} : memref<8x128xf32, #tpu.memory_space<vmem>>, vector<8x128xf32>,
    return
  }
  func.func @transform_0(%arg0: i32) -> (i32, i32) {
    %c0_i32 = arith.constant 0 : i32
    %c0_i32_0 = arith.constant 0 : i32
    return %arg0, %c0_i32 : i32, i32
  }
  func.func @transform_1(%arg0: i32) -> (i32, i32) {
    %c0_i32 = arith.constant 0 : i32
    %c0_i32_0 = arith.constant 0 : i32
    return %arg0, %c0_i32 : i32, i32
  }
  func.func @transform_2(%arg0: i32) -> (i32, i32) {
    %c0_i32 = arith.constant 0 : i32
    %c0_i32_0 = arith.constant 0 : i32
    return %arg0, %c0_i32 : i32, i32
  }
  func.func @transform_3(%arg0: i32) -> (i32, i32) {
    %c0_i32 = arith.constant 0 : i32
    %c0_i32_0 = arith.constant 0 : i32
    return %arg0, %c0_i32 : i32, i32
  }
  func.func @transform_4(%arg0: i32) -> (i32, i32) {
    %c0_i32 = arith.constant 0 : i32
    %c0_i32_0 = arith.constant 0 : i32
    return %arg0, %c0_i32 : i32, i32
  }
}

</mosaic_0001>

<bundles_post_ra>
// kernel: weighted_l1_loss.1
= control target key start
LH: loop header
LB: loop body
LE: loop exit
PB: predicated region body
PF: predicated region fallthrough
CT: control target
= control target key end

     0   :  { %s89_s0 = inlined_call_operand.vmem [shape: f32[16,128], index: 0, kind: input, shape index: {}]   ;;  %s90_s1 = inlined_call_operand.vmem [shape: f32[16,128], index: 1, kind: input, shape index: {}]   ;;  %s91_s2 = inlined_call_operand.vmem [shape: f32[16,128], index: 2, kind: input, shape index: {}]   ;;  %s92_s4 = inlined_call_operand.vmem [shape: f32[8,128], index: 4, kind: output, shape index: {1}]   ;;  %s93_s3 = inlined_call_operand.vmem [shape: f32[8,128], index: 3, kind: output, shape index: {0}]  }
   0x1   :  { %v16_v0 = vld [vmem:[%s89_s0] sm:$0xff]  ;;  %v17_v1 = vld [vmem:[%s89_s0 + $0x8] sm:$0xff] }
   0x2   :  { %v18_v2 = vld [vmem:[%s90_s1] sm:$0xff]  ;;  %v19_v3 = vld [vmem:[%s90_s1 + $0x8] sm:$0xff] }
   0x3   :  { %v20_v4 = vld [vmem:[%s91_s2] sm:$0xff]  ;;  %v21_v5 = vld [vmem:[%s91_s2 + $0x8] sm:$0xff]  ;;  %v22_v6 = vsub.f32 %v16_v0, %v18_v2  ;;  %v23_v7 = vsub.f32 %v17_v1, %v19_v3 }
   0x4   :  { %v30_v8 = vadd.f32 %v21_v5, %v20_v4 }
   0x5   :  { %v24_v9 = vand.u32 2147483647, %v22_v6  ;;  %v25_v10 = vand.u32 2147483647, %v23_v7 }
   0x6   :  { %31 = vst [vmem:[%s92_s4] sm:$0xff] %v30_v8 }
   0x7   :  { %v26_v11 = vmul.f32 %v24_v9, %v20_v4  ;;  %v27_v12 = vmul.f32 %v25_v10, %v21_v5 }
   0x9   :  { %v28_v13 = vadd.f32 %v27_v12, %v26_v11 }
   0xb   :  { %29 = vst [vmem:[%s93_s3] sm:$0xff] %v28_v13 }

</bundles_post_ra>
